<compile_context>
chip_gen: v7x
topology: tpu7x:2x2x1
jax: 0.10.0
libtpu: 0.0.40
codegen_flags: <defaults>
</compile_context>

<pallas_src>
import jax
import jax.numpy as jnp
from jax.experimental import pallas as pl
from jax.experimental.pallas import tpu as pltpu


def _round_up(x, m):
    return ((x + m - 1) // m) * m


def _vmem_footprint(tm, tn, tk, in_isz, out_isz, use_acc):
    """Approximate VMEM bytes for double-buffered tiles + bias + accumulator."""
    f = 2 * tm * tk * in_isz          # x tiles (double-buffered)
    f += 2 * tk * tn * in_isz         # weight tiles
    f += 2 * tm * tn * out_isz        # output tiles
    f += 2 * 8 * tn * 4               # bias row (padded to 8 sublanes)
    if use_acc:
        f += tm * tn * 4              # f32 scratch accumulator
    return f


# ----------------------------------------------------------------------------
# Kernels
# ----------------------------------------------------------------------------
def _linear_kernel_f32_out(x_ref, w_ref, b_ref, o_ref):
    """f32 output: accumulate directly into the VMEM-resident output block."""
    k = pl.program_id(2)
    d = jnp.dot(x_ref[...], w_ref[...], preferred_element_type=jnp.float32)

    @pl.when(k == 0)
    def _init():
        o_ref[...] = b_ref[...] + d          # bias added exactly once, in f32

    @pl.when(k > 0)
    def _accum():
        o_ref[...] += d


def _linear_kernel_acc(x_ref, w_ref, b_ref, o_ref, acc_ref):
    """Non-f32 output: f32 scratch accumulator, cast on the last k step."""
    k = pl.program_id(2)
    d = jnp.dot(x_ref[...], w_ref[...], preferred_element_type=jnp.float32)

    @pl.when(k == 0)
    def _init():
        acc_ref[...] = b_ref[...] + d

    @pl.when(k > 0)
    def _accum():
        acc_ref[...] += d

    @pl.when(k == pl.num_programs(2) - 1)
    def _finalize():
        o_ref[...] = acc_ref[...].astype(o_ref.dtype)


# ----------------------------------------------------------------------------
# Wrapper with setup-time parameter preparation
# ----------------------------------------------------------------------------
class PallasLinear:
    """y = x @ weight.T + bias, with weight/bias prepared once at construction.

    weight: [output_size, input_size] (PyTorch nn.Linear layout)
    bias:   [output_size]
    compute_dtype: None -> compute in weight dtype (exact).  Pass jnp.bfloat16
        to opt in to bf16 MXU compute with f32 accumulation (faster, looser
        accuracy than the f32 PyTorch Linear).
    """

    _VMEM_TARGET = 40 << 20   # tile-selection budget (portable to v7x's 64 MiB)

    def __init__(self, weight, bias, *, compute_dtype=None,
                 tm=512, tn=512, tk=1024, weight_buffers=None):
        N, K = weight.shape
        assert bias.shape == (N,), (bias.shape, N)
        self.N, self.K = N, K
        self.compute_dtype = jnp.dtype(compute_dtype if compute_dtype is not None
                                       else weight.dtype)
        self.tm_default = int(tm)
        self.weight_buffers = weight_buffers
        in_isz = self.compute_dtype.itemsize

        # --- choose tn: clamp to padded N, ensure >= 2 j-blocks when possible
        #     (keeps both v7x TensorCores busy even with a single i-block).
        N_pb = _round_up(N, 128)
        tn = int(min(tn, N_pb))
        if N_pb >= 256:
            tn = min(tn, _round_up(N_pb // 2, 128))
        self.tn = tn
        self.N_p = _round_up(N_pb, tn)

        # --- choose tk: single reduction step whenever the full-K tiles fit
        #     the VMEM budget; otherwise fall back to the default tile size.
        K_pb = _round_up(K, 128)
        if _vmem_footprint(self.tm_default, tn, K_pb, in_isz, 4, True) <= self._VMEM_TARGET:
            tk = K_pb
        else:
            tk = int(min(tk, K_pb))
            while (_vmem_footprint(self.tm_default, tn, tk, in_isz, 4, True)
                   > self._VMEM_TARGET and tk > 128):
                tk = max(128, (tk // 2) // 128 * 128)
        self.tk = tk
        self.K_p = _round_up(K_pb, tk)

        # --- prepare parameters ONCE (amortized over all calls):
        #     cast -> zero-pad -> transpose to [K_p, N_p] for the canonical
        #     A[tm,tk] @ W[tk,tn] MXU contraction.
        w = weight.astype(self.compute_dtype)
        if (self.N_p, self.K_p) != (N, K):
            w = jnp.pad(w, ((0, self.N_p - N), (0, self.K_p - K)))
        self.w_t = jnp.asarray(w.T)                       # [K_p, N_p]

        b = bias.astype(jnp.float32)
        if self.N_p != N:
            b = jnp.pad(b, (0, self.N_p - N))
        self.b_row = b.reshape(1, self.N_p)               # [1, N_p] f32

    def __call__(self, x):
        B, K = x.shape
        assert K == self.K, (K, self.K)
        out_dtype = x.dtype
        tn, tk, N_p, K_p = self.tn, self.tk, self.N_p, self.K_p
        in_isz = self.compute_dtype.itemsize
        out_isz = jnp.dtype(out_dtype).itemsize

        # bf16 packs 2 rows per sublane -> align rows to 16; f32 -> 8.
        row_align = 16 if in_isz < 4 else 8
        tm = int(min(self.tm_default, _round_up(B, row_align)))
        B_p = _round_up(B, tm)

        x_p = x.astype(self.compute_dtype)
        if (B_p, K_p) != (B, K):
            x_p = jnp.pad(x_p, ((0, B_p - B), (0, K_p - K)))

        grid = (B_p // tm, N_p // tn, K_p // tk)

        use_acc = (jnp.dtype(out_dtype) != jnp.dtype(jnp.float32))
        kernel = _linear_kernel_acc if use_acc else _linear_kernel_f32_out
        scratch = [pltpu.VMEM((tm, tn), jnp.float32)] if use_acc else []

        footprint = _vmem_footprint(tm, tn, tk, in_isz, out_isz, use_acc)
        vmem_limit = int(min(64 << 20, max(32 << 20, footprint + (6 << 20))))

        if self.weight_buffers is not None and self.weight_buffers > 2:
            # Optional deeper buffering on the long weight stream (sweepable).
            w_spec = pl.BlockSpec((tk, tn), lambda i, j, k: (k, j),
                                  pipeline_mode=pl.Buffered(self.weight_buffers))
        else:
            w_spec = pl.BlockSpec((tk, tn), lambda i, j, k: (k, j))

        flops = 2 * B_p * K_p * N_p
        bytes_accessed = (B_p * K_p * in_isz + K_p * N_p * in_isz
                          + N_p * 4 + B_p * N_p * out_isz)

        out = pl.pallas_call(
            kernel,
            out_shape=jax.ShapeDtypeStruct((B_p, N_p), out_dtype),
            grid_spec=pltpu.PrefetchScalarGridSpec(
                num_scalar_prefetch=0,
                grid=grid,
                in_specs=[
                    pl.BlockSpec((tm, tk), lambda i, j, k: (i, k)),   # x
                    w_spec,                                           # weight [K,N]
                    pl.BlockSpec((1, tn), lambda i, j, k: (0, j)),    # bias
                ],
                out_specs=pl.BlockSpec((tm, tn), lambda i, j, k: (i, j)),
                scratch_shapes=scratch,
            ),
            compiler_params=pltpu.CompilerParams(
                dimension_semantics=("parallel", "parallel", "arbitrary"),
                vmem_limit_bytes=vmem_limit),
            cost_estimate=pl.CostEstimate(
                flops=flops, transcendentals=0, bytes_accessed=bytes_accessed),
        )(x_p, self.w_t, self.b_row)

        if (B_p, N_p) != (B, self.N):
            out = out[:B, :self.N]
        return out


def lr_forward(x, weight, bias, **kwargs):
    """One-shot convenience wrapper (re-prepares params every call).

    For repeated calls build `PallasLinear(weight, bias)` once and reuse it —
    that amortizes the weight cast / pad / transpose HBM passes.
    """
    return PallasLinear(weight, bias, **kwargs)(x)


if __name__ == "__main__":
    # Small shapes consistent with the module: LR(input_size=32, output_size=16)
    B, input_size, output_size = 8, 32, 16

    key = jax.random.PRNGKey(0)
    kx, kw, kb = jax.random.split(key, 3)

    # Deterministic parameter init mimicking nn.Linear's U(-1/sqrt(K), 1/sqrt(K))
    bound = 1.0 / jnp.sqrt(jnp.float32(input_size))
    weight = jax.random.uniform(kw, (output_size, input_size),
                                jnp.float32, -bound, bound)
    bias = jax.random.uniform(kb, (output_size,), jnp.float32, -bound, bound)

    x = jax.random.normal(kx, (B, input_size), jnp.float32)

    # Prepare parameters once; jit the per-call activation path.
    lr = PallasLinear(weight, bias)          # exact f32 compute (bf16 is opt-in)
    fwd = jax.jit(lambda a: lr(a))
    y = fwd(x)
    jax.block_until_ready(y)

    # Reference check against plain JAX
    y_ref = x @ weight.T + bias
    assert y.shape == (B, output_size)
    assert jnp.allclose(y, y_ref, atol=1e-5, rtol=1e-5)

    print("KERNEL_OK")
</pallas_src>

<mosaic_0001>
module attributes {stable_mosaic.version = 11 : i64} {
  func.func @_linear_kernel_f32_out(%arg0: i32, %arg1: i32, %arg2: i32, %arg3: memref<8x128xf32, #tpu.memory_space<vmem>>, %arg4: memref<128x128xf32, #tpu.memory_space<vmem>>, %arg5: memref<1x128xf32, #tpu.memory_space<vmem>>, %arg6: memref<8x128xf32, #tpu.memory_space<vmem>>) attributes {dimension_semantics = [#tpu.dimension_semantics<parallel>, #tpu.dimension_semantics<parallel>, #tpu.dimension_semantics<arbitrary>], iteration_bounds = array<i64: 1, 1, 1>, scalar_prefetch = 0 : i64, scratch_operands = 0 : i64, tpu.core_type = #tpu.core_type<tc>, window_params = [{transform_indices = @transform_0, window_bounds = array<i64: 8, 128>}, {transform_indices = @transform_1, window_bounds = array<i64: 128, 128>}, {transform_indices = @transform_2, window_bounds = array<i64: 1, 128>}, {transform_indices = @transform_3, window_bounds = array<i64: 8, 128>}]} {
    %c0 = arith.constant 0 : index
    %c0_0 = arith.constant 0 : index
    %0 = vector.load %arg3[%c0, %c0_0] : memref<8x128xf32, #tpu.memory_space<vmem>>, vector<8x128xf32>
    %c0_1 = arith.constant 0 : index
    %c0_2 = arith.constant 0 : index
    %1 = vector.load %arg4[%c0_1, %c0_2] : memref<128x128xf32, #tpu.memory_space<vmem>>, vector<128x128xf32>
    %cst = arith.constant dense<0.000000e+00> : vector<8x128xf32>
    %2 = tpu.matmul %0, %1, %cst {dimension_numbers = #tpu.dot_dimension_numbers<[1], [0], [0], [1], [0, 0, 1, 1], [], []>} : vector<8x128xf32>, vector<128x128xf32>, vector<8x128xf32> -> vector<8x128xf32>
    %c0_i32 = arith.constant 0 : i32
    %3 = arith.cmpi eq, %arg2, %c0_i32 : i32
    %4 = arith.extui %3 : i1 to i32
    %c0_i32_3 = arith.constant 0 : i32
    %5 = arith.cmpi ne, %4, %c0_i32_3 : i32
    scf.if %5 {
      %c0_6 = arith.constant 0 : index
      %c0_7 = arith.constant 0 : index
      %9 = vector.load %arg5[%c0_6, %c0_7] : memref<1x128xf32, #tpu.memory_space<vmem>>, vector<1x128xf32>
      %10 = vector.broadcast %9 : vector<1x128xf32> to vector<8x128xf32>
      %11 = arith.addf %10, %2 : vector<8x128xf32>
      %c0_8 = arith.constant 0 : index
      %c0_9 = arith.constant 0 : index
      %12 = vector.load %arg6[%c0_8, %c0_9] : memref<8x128xf32, #tpu.memory_space<vmem>>, vector<8x128xf32>
      tpu.vector_store %arg6[%c0_8, %c0_9], %11 {strides = array<i32>} : memref<8x128xf32, #tpu.memory_space<vmem>>, vector<8x128xf32>,
    } else {
    }
    %c0_i32_4 = arith.constant 0 : i32
    %6 = arith.cmpi sgt, %arg2, %c0_i32_4 : i32
    %7 = arith.extui %6 : i1 to i32
    %c0_i32_5 = arith.constant 0 : i32
    %8 = arith.cmpi ne, %7, %c0_i32_5 : i32
    scf.if %8 {
      %c0_6 = arith.constant 0 : index
      %c0_7 = arith.constant 0 : index
      %9 = vector.load %arg6[%c0_6, %c0_7] : memref<8x128xf32, #tpu.memory_space<vmem>>, vector<8x128xf32>
      %10 = arith.addf %9, %2 : vector<8x128xf32>
      %c0_8 = arith.constant 0 : index
      %c0_9 = arith.constant 0 : index
      %11 = vector.load %arg6[%c0_8, %c0_9] : memref<8x128xf32, #tpu.memory_space<vmem>>, vector<8x128xf32>
      tpu.vector_store %arg6[%c0_8, %c0_9], %10 {strides = array<i32>} : memref<8x128xf32, #tpu.memory_space<vmem>>, vector<8x128xf32>,
    } else {
    }
    return
  }
  func.func @transform_0(%arg0: i32, %arg1: i32, %arg2: i32) -> (i32, i32) {
    %c0_i32 = arith.constant 0 : i32
    return %arg0, %arg2 : i32, i32
  }
  func.func @transform_1(%arg0: i32, %arg1: i32, %arg2: i32) -> (i32, i32) {
    %c0_i32 = arith.constant 0 : i32
    return %arg2, %arg1 : i32, i32
  }
  func.func @transform_2(%arg0: i32, %arg1: i32, %arg2: i32) -> (i32, i32) {
    %c0_i32 = arith.constant 0 : i32
    %c0_i32_0 = arith.constant 0 : i32
    return %c0_i32, %arg1 : i32, i32
  }
  func.func @transform_3(%arg0: i32, %arg1: i32, %arg2: i32) -> (i32, i32) {
    %c0_i32 = arith.constant 0 : i32
    return %arg0, %arg1 : i32, i32
  }
}

</mosaic_0001>

<bundles_post_ra>
// kernel: _lambda_.1
= control target key start
LH: loop header
LB: loop body
LE: loop exit
PB: predicated region body
PF: predicated region fallthrough
CT: control target
= control target key end

     0   :  { %8 = vsyncpa [#allocation3], 0  ;;  %s340_s0 = inlined_call_operand.vmem [shape: f32[8,128], index: 0, kind: input, shape index: {}]   ;;  %s341_s1 = inlined_call_operand.hbm [shape: f32[128,128], index: 1, kind: input, shape index: {}]   ;;  %s342_s2 = inlined_call_operand.vmem [shape: f32[1,128], index: 2, kind: input, shape index: {}]   ;;  %s343_s3 = inlined_call_operand.hbm [shape: f32[8,128], index: 3, kind: output, shape index: {}]  }
   0x1   :  { %9 = vsyncpa [#allocation4], 0  ;;  %s283_s12 = smov [#allocation2]   ;;  %s235_s16 = scalar_lea.hbm %s341_s1, 2048 }
   0x2   :  { %s17_s13 = sshll.u32 %s283_s12, 4  ;;  %p236_p0 = scmp.ne.s32.totalorder %s341_s1, %s235_s16  ;;  %s18_s13 = int_to_ptr.vmem [resolvable:$true] %s17_s13 }
   0x3   :  { %p239_p1 = scmp.lt.u32.totalorder %s235_s16, %s341_s1 }
   0x5   :  { %p241_p2 = pnand %p239_p1, %p236_p0 }
   0x7   :  { %244 = shalt.err (!%p241_p2)
}
   0x8   :  { %s245_s21 = scalar_lea.vmem %s18_s13, 2048  ;;  %p250_p4 = scmp.lt.s32.totalorder %s18_s13, %s18_s13 }
   0x9   :  { %p246_p3 = scmp.ne.s32.totalorder %s18_s13, %s245_s21  ;;  %p251_p5 = scmp.lt.s32.totalorder %s245_s21, %s245_s21 }
   0xb   :  { %p252_p6 = por %p251_p5, %p250_p4 }
   0xd   :  { %p253_p7 = pnand %p252_p6, %p246_p3 }
   0xf   :  { %256 = shalt.err (!%p253_p7)
}
  0x10   :  { %s284_s22 = smov 128   ;;  %s285_s23 = smov 8  }
  0x11   :  { %23 = dma.hbm_to_vmem [thread:$0]  %s341_s1, 2048, %s18_s13, [#allocation3], %s284_s22, %s284_s22, %s285_s23  }
  0x12   :  { %279 = dma.done.wait [#allocation3], 2048  }
  0x13   :  { %280 = vsyncadd [#allocation3], 4294965248  ;;  %v286_v0 = vmov 0.0|0.0   ;;  %vm287_vm0 = vmmov 0   ;;  %v288_v1 = vmov 0.0   ;;  %v30_v2 = vld [vmem:[#allocation2] sm:$0xff] }
  0x14   :  { %204 = vmatprep.subr.bf16.mxu0 %v286_v0  ;;  %201 = vmatprep.mubr.msk.f32.mxu0 %vm287_vm0, %v288_v1  ;;  %v31_v3 = vld [vmem:[#allocation2 + $0x8] sm:$0xff]  ;;  %v32_v4 = vld [vmem:[#allocation2 + $0x10] sm:$0xff]  ;;  %v33_v6 = vld [vmem:[#allocation2 + $0x18] sm:$0xff]  ;;  %s289_s29 = smov [#allocation5]  }
  0x15   :  { %v205_v5 = vpack.c.bf16 %v31_v3, %v30_v2  ;;  %v208_v7 = vpack.c.bf16 %v33_v6, %v32_v4  ;;  %v34_v8 = vld [vmem:[#allocation2 + $0x20] sm:$0xff]  ;;  %v35_v9 = vld [vmem:[#allocation2 + $0x28] sm:$0xff]  ;;  %v36_v11 = vld [vmem:[#allocation2 + $0x30] sm:$0xff]  ;;  %s142_s30 = sshll.u32 %s289_s29, 4  ;;  %s143_s30 = int_to_ptr.vmem [resolvable:$true] %s142_s30 }
  0x16   :  { %v211_v10 = vpack.c.bf16 %v35_v9, %v34_v8  ;;  %v37_v12 = vld [vmem:[#allocation2 + $0x38] sm:$0xff]  ;;  %v38_v14 = vld [vmem:[#allocation2 + $0x40] sm:$0xff]  ;;  %v39_v15 = vld [vmem:[#allocation2 + $0x48] sm:$0xff]  ;;  %s257_s4 = scalar_lea.vmem %s143_s30, 128  ;;  %p262_p9 = scmp.lt.s32.totalorder %s143_s30, %s143_s30 }
  0x17   :  { %206 = vmatpush3.bf16.msra.mxu0 %v205_v5  ;;  %v214_v13 = vpack.c.bf16 %v37_v12, %v36_v11  ;;  %v217_v16 = vpack.c.bf16 %v39_v15, %v38_v14  ;;  %v40_v17 = vld [vmem:[#allocation2 + $0x50] sm:$0xff]  ;;  %v41_v18 = vld [vmem:[#allocation2 + $0x58] sm:$0xff]  ;;  %v42_v20 = vld [vmem:[#allocation2 + $0x60] sm:$0xff]  ;;  %p258_p8 = scmp.ne.s32.totalorder %s143_s30, %s257_s4  ;;  %p263_p10 = scmp.lt.s32.totalorder %s257_s4, %s257_s4 }
  0x18   :  { %207 = vmatprep.subr.bf16.mxu0 %v286_v0  ;;  %v220_v19 = vpack.c.bf16 %v41_v18, %v40_v17  ;;  %v43_v21 = vld [vmem:[#allocation2 + $0x68] sm:$0xff]  ;;  %v44_v23 = vld [vmem:[#allocation2 + $0x70] sm:$0xff]  ;;  %v45_v24 = vld [vmem:[#allocation2 + $0x78] sm:$0xff] }
  0x19   :  { %v223_v22 = vpack.c.bf16 %v43_v21, %v42_v20  ;;  %v226_v25 = vpack.c.bf16 %v45_v24, %v44_v23  ;;  %v29_v26 = vld [vmem:[%s340_s0] sm:$0xff]  ;;  %p264_p11 = por %p263_p10, %p262_p9 }
  0x1a   :  { %v151_v27 = vld [vmem:[%s342_s2] ss:$0 sm:$0xff] }
  0x1b   :  { %209 = vmatpush3.bf16.msra.mxu0 %v208_v7  ;;  %p265_p12 = pnand %p264_p11, %p258_p8 }
  0x1c   :  { %210 = vmatprep.subr.bf16.mxu0 %v286_v0 }
  0x1f   :  { %212 = vmatpush3.bf16.msra.mxu0 %v211_v10 }
  0x20   :  { %213 = vmatprep.subr.bf16.mxu0 %v286_v0 }
  0x23   :  { %215 = vmatpush3.bf16.msra.mxu0 %v214_v13 }
  0x24   :  { %216 = vmatprep.subr.bf16.mxu0 %v286_v0 }
  0x27   :  { %218 = vmatpush3.bf16.msra.mxu0 %v217_v16 }
  0x28   :  { %219 = vmatprep.subr.bf16.mxu0 %v286_v0 }
  0x2b   :  { %221 = vmatpush3.bf16.msra.mxu0 %v220_v19 }
  0x2c   :  { %222 = vmatprep.subr.bf16.mxu0 %v286_v0 }
  0x2f   :  { %224 = vmatpush3.bf16.msra.mxu0 %v223_v22 }
  0x30   :  { %225 = vmatprep.subr.bf16.mxu0 %v286_v0 }
  0x33   :  { %227 = vmatpush3.bf16.msra.mxu0 %v226_v25 }
  0x36   :  { %202 = vmatmul.mubr.f32.vlgmr.msra.gmra.mrb[0].mxu0 %v29_v26 }
 0x109   :  { %v112_v28 = vpop.f32.mrb[0].mxu0 }
 0x10a   :  { %v127_v29 = vadd.f32 %v151_v27, %v112_v28  ;;  %v203_v30 = vpop.f32.mrb[1].mxu0 }
 0x10c   :  { %128 = vst [vmem:[#allocation5] sm:$0xff] %v127_v29 }
 0x10d   :  { %268 = shalt.err (!%p265_p12)
}
 0x10e   :  { %s269_s6 = scalar_lea.hbm %s343_s3, 128 }
 0x10f   :  { %p270_p13 = scmp.ne.s32.totalorder %s343_s3, %s269_s6  ;;  %p273_p0 = scmp.lt.u32.totalorder %s269_s6, %s343_s3 }
 0x111   :  { %p275_p1 = pnand %p273_p0, %p270_p13 }
 0x113   :  { %278 = shalt.err (!%p275_p1)
}
 0x114   :  { %145 = dma.vmem_to_hbm [thread:$0]  %s143_s30, 128, %s343_s3, [#allocation4]  }
 0x115   :  { %281 = dma.done.wait [#allocation4], 128  }
 0x116   :  { %282 = vsyncadd [#allocation4], 4294967168 }
 0x117   :  { %149 = vsyncpa [#allocation3], 1 }
 0x118   :  { %150 = vsyncpa [#allocation4], 1 }

</bundles_post_ra>
